<compile_context>
chip_gen: v7x
topology: tpu7x:2x2x1
jax: 0.10.0
libtpu: 0.0.40
codegen_flags: <defaults>
</compile_context>

<pallas_src>
import jax
import jax.numpy as jnp
from jax.experimental import pallas as pl
from jax.experimental.pallas import tpu as pltpu


def _round_up(x, m):
    return (x + m - 1) // m * m


# polyphase index sets shared by the kernel body and the weight packing
_SHIFTS = ((0, 0), (0, 1), (1, 0), (1, 1))   # (di, dj) input shifts used by the conv-transpose
_PHASES = ((0, 0), (0, 1), (1, 0), (1, 1))   # (rh, rw) output parity phases
_D_FOR_S = {0: (0, 1), 1: (-1, 0)}           # feat-phase parity s -> feat shifts d used by the 3x3 conv
# combined boundary masks, one row per (dh, dw) shift actually used ((0,0) needs none)
_MASK_SHIFTS = ((0, 1), (0, -1), (1, 0), (-1, 0), (1, 1), (1, -1), (-1, 1), (-1, -1))
_TILE_COLS_TARGET = 8192                     # ~10 MiB live VMEM per step in f32 (v7x-safe)


def _make_kernel(H, W, cmid_p, tile_cols):
    def kernel(mask_ref, x_ref, w1_ref, b1_ref, w2_ref, b2_ref, feat_ref, out_ref):
        # hoisted: read each combined boundary mask exactly once per invocation
        masks = {s: mask_ref[i:i + 1, :] for i, s in enumerate(_MASK_SHIFTS)}

        def shift2d(a, dh, dw):
            # b[c, n*HWp + i*W + j] = a[c, n*HWp + (i+dh)*W + (j+dw)]  (0 outside the HxW grid)
            if dh == 0 and dw == 0:
                return a
            s = dh * W + dw
            b = pltpu.roll(a, shift=(-s) % tile_cols, axis=1)     # XLU, not VALU
            return b * masks[(dh, dw)]                            # single combined-mask multiply

        x = x_ref[...]                                            # (CinP, T)

        # ---- ConvTranspose2d (polyphase): one K = 4*CinP matmul --------------------
        xs = jnp.concatenate([shift2d(x, di, dj) for di, dj in _SHIFTS], axis=0)
        feat = jnp.dot(w1_ref[...], xs, preferred_element_type=jnp.float32)
        feat = feat + b1_ref[...]                                 # (4*CmidP, T)
        feat_ref[...] = feat.astype(feat_ref.dtype)
        # TODO(synk): if the caller tolerates bf16 feat, store bf16 here (and feed bf16
        # x/weights to the matmuls) to roughly halve HBM traffic; accumulation stays f32.

        # ---- Conv2d 3x3 on feat, per feat phase (small fstack, 4 small-K matmuls) ---
        acc = None
        for ph, (sh, sw) in enumerate(_PHASES):
            f_ph = feat[ph * cmid_p:(ph + 1) * cmid_p, :]
            slabs = [shift2d(f_ph, dh, dw)
                     for dh in _D_FOR_S[sh] for dw in _D_FOR_S[sw]]
            fstack_ph = jnp.concatenate(slabs, axis=0)            # (4*CmidP, T)
            part = jnp.dot(w2_ref[ph], fstack_ph, preferred_element_type=jnp.float32)
            acc = part if acc is None else acc + part
        out_ref[...] = (acc + b2_ref[...]).astype(out_ref.dtype)  # (MLp, T)

    return kernel


def importance_map_forward(x_nchw, wt, bt, wg, bg):
    """x: (N,12,H,W); wt: (12,6,3,3); bt: (6,); wg: (ML,6,3,3); bg: (ML,)."""
    N, Cin, H, W = x_nchw.shape
    Cmid = wt.shape[1]
    ML = wg.shape[0]
    HW = H * W
    dtype = x_nchw.dtype

    cin_p = _round_up(Cin, 8)
    cmid_p = _round_up(Cmid, 8)
    mlp = _round_up(4 * ML, 8)               # padded output rows -> unmasked stores
    hw_p = _round_up(HW, 128)                # keep the lane axis 128-dense

    # batch folded onto lanes: each lane tile holds a whole number of images
    b_tile = max(1, min(N, _TILE_COLS_TARGET // hw_p))
    n_pad = _round_up(N, b_tile)
    tile_cols = b_tile * hw_p
    grid = (n_pad // b_tile,)

    # ---- input: NCHW -> channel-major (CinP, N_pad*HWp), batch+spatial on lanes ----
    x_flat = x_nchw.reshape(N, Cin, HW)
    x_flat = jnp.pad(x_flat, ((0, n_pad - N), (0, cin_p - Cin), (0, hw_p - HW)))
    x_cm = jnp.transpose(x_flat, (1, 0, 2)).reshape(cin_p, n_pad * hw_p)

    # ---- combined boundary masks (8 rows; one multiply per shifted slab in-kernel) --
    p = jnp.arange(hw_p, dtype=jnp.int32)
    row, col = p // W, p % W
    valid = p < HW

    def bmask(dh, dw):
        m = valid
        if dh == 1:
            m = m & (row < H - 1)
        elif dh == -1:
            m = m & (row > 0)
        if dw == 1:
            m = m & (col < W - 1)
        elif dw == -1:
            m = m & (col > 0)
        return m

    mask_img = jnp.stack([bmask(dh, dw) for dh, dw in _MASK_SHIFTS]).astype(dtype)
    masks = jnp.tile(mask_img, (1, b_tile))                       # (8, tile_cols)

    # ---- pack polyphase weights ------------------------------------------------------
    # conv-transpose: feat[c, 2i+rh, 2j+rw] = bt[c] + sum_{(di,dj),cin}
    #   wt[cin, c, kh, kw] * x[cin, i+di, j+dj], kh = rh-2*di+1, kw = rw-2*dj+1
    w1big = jnp.zeros((4 * cmid_p, 4 * cin_p), dtype)
    b1big = jnp.zeros((4 * cmid_p, 1), dtype)
    for ph, (rh, rw) in enumerate(_PHASES):
        b1big = b1big.at[ph * cmid_p:ph * cmid_p + Cmid, 0].set(bt.astype(dtype))
        for si, (di, dj) in enumerate(_SHIFTS):
            kh, kw = rh - 2 * di + 1, rw - 2 * dj + 1
            if 0 <= kh <= 2 and 0 <= kw <= 2:
                w1big = w1big.at[ph * cmid_p:ph * cmid_p + Cmid,
                                 si * cin_p:si * cin_p + Cin].set(
                                     wt[:, :, kh, kw].T.astype(dtype))

    # 3x3 conv in the polyphase domain, columns grouped BY FEAT PHASE so the kernel can
    # run 4 small-K matmuls without materializing a 16*CmidP fstack.
    # kh = 2*dh + sh - rh + 1 (and same formula for kw).
    w2big = jnp.zeros((4, mlp, 4 * cmid_p), dtype)
    b2big = jnp.zeros((mlp, 1), dtype)
    for pr, (rh, rw) in enumerate(_PHASES):
        b2big = b2big.at[pr * ML:(pr + 1) * ML, 0].set(bg.astype(dtype))
        for ph, (sh, sw) in enumerate(_PHASES):
            for ti, dh in enumerate(_D_FOR_S[sh]):
                kh = 2 * dh + sh - rh + 1
                if not 0 <= kh <= 2:
                    continue
                for tj, dw in enumerate(_D_FOR_S[sw]):
                    kw = 2 * dw + sw - rw + 1
                    if not 0 <= kw <= 2:
                        continue
                    cc = ti * 2 + tj
                    w2big = w2big.at[ph, pr * ML:(pr + 1) * ML,
                                     cc * cmid_p:cc * cmid_p + Cmid].set(
                                         wg[:, :, kh, kw].astype(dtype))

    kernel = _make_kernel(H, W, cmid_p, tile_cols)

    feat_ph, out_ph = pl.pallas_call(
        kernel,
        out_shape=(
            jax.ShapeDtypeStruct((4 * cmid_p, n_pad * hw_p), dtype),
            jax.ShapeDtypeStruct((mlp, n_pad * hw_p), dtype),
        ),
        grid=grid,
        in_specs=[
            pl.BlockSpec((8, tile_cols), lambda g: (0, 0)),                 # masks
            pl.BlockSpec((cin_p, tile_cols), lambda g: (0, g)),             # x (channel-major)
            pl.BlockSpec((4 * cmid_p, 4 * cin_p), lambda g: (0, 0)),        # w1 (polyphase)
            pl.BlockSpec((4 * cmid_p, 1), lambda g: (0, 0)),                # b1
            pl.BlockSpec((4, mlp, 4 * cmid_p), lambda g: (0, 0, 0)),        # w2 (phase-grouped)
            pl.BlockSpec((mlp, 1), lambda g: (0, 0)),                       # b2
        ],
        out_specs=(
            pl.BlockSpec((4 * cmid_p, tile_cols), lambda g: (0, g)),        # feat (phase layout)
            pl.BlockSpec((mlp, tile_cols), lambda g: (0, g)),               # out  (phase layout)
        ),
        compiler_params=pltpu.CompilerParams(
            dimension_semantics=("parallel",),
            vmem_limit_bytes=32 * 1024 * 1024),
    )(masks, x_cm, w1big, b1big, w2big, b2big)

    # ---- un-phase back to NCHW (pure layout plumbing in XLA) -------------------------
    feat = feat_ph.reshape(2, 2, cmid_p, n_pad, hw_p)[:, :, :Cmid, :N, :HW]
    feat = feat.reshape(2, 2, Cmid, N, H, W)
    feat = jnp.transpose(feat, (3, 2, 4, 0, 5, 1)).reshape(N, Cmid, 2 * H, 2 * W)

    out = out_ph[:4 * ML].reshape(2, 2, ML, n_pad, hw_p)[:, :, :, :N, :HW]
    out = out.reshape(2, 2, ML, N, H, W)
    out = jnp.transpose(out, (3, 2, 4, 0, 5, 1)).reshape(N, ML, 2 * H, 2 * W)
    return feat, out


# ----------------------------------------------------------------------------
# Pure-JAX reference (lax.conv_general_dilated) for correctness checking.
# ----------------------------------------------------------------------------
def _ref_forward(x, wt, bt, wg, bg):
    # transposed conv == conv with lhs_dilation + flipped weights (OIHW)
    w1 = jnp.transpose(wt[:, :, ::-1, ::-1], (1, 0, 2, 3))
    feat = jax.lax.conv_general_dilated(
        x, w1, window_strides=(1, 1), padding=((1, 2), (1, 2)),
        lhs_dilation=(2, 2), dimension_numbers=("NCHW", "OIHW", "NCHW"))
    feat = feat + bt[None, :, None, None]
    out = jax.lax.conv_general_dilated(
        feat, wg, window_strides=(1, 1), padding=((1, 1), (1, 1)),
        dimension_numbers=("NCHW", "OIHW", "NCHW"))
    out = out + bg[None, :, None, None]
    return feat, out


if __name__ == "__main__":
    key = jax.random.PRNGKey(0)
    k_x, k_wt, k_bt, k_wg, k_bg = jax.random.split(key, 5)

    N, Cin, H, W = 2, 12, 16, 16
    map_layers = 1

    x = jax.random.normal(k_x, (N, Cin, H, W), jnp.float32)

    # deterministic parameter init (uniform +/- 1/sqrt(fan_in), like PyTorch defaults)
    fan_t = Cin * 3 * 3
    wt = jax.random.uniform(k_wt, (Cin, 6, 3, 3), jnp.float32,
                            -1.0 / jnp.sqrt(fan_t), 1.0 / jnp.sqrt(fan_t))
    bt = jax.random.uniform(k_bt, (6,), jnp.float32,
                            -1.0 / jnp.sqrt(fan_t), 1.0 / jnp.sqrt(fan_t))
    fan_g = 6 * 3 * 3
    wg = jax.random.uniform(k_wg, (map_layers, 6, 3, 3), jnp.float32,
                            -1.0 / jnp.sqrt(fan_g), 1.0 / jnp.sqrt(fan_g))
    bg = jax.random.uniform(k_bg, (map_layers,), jnp.float32,
                            -1.0 / jnp.sqrt(fan_g), 1.0 / jnp.sqrt(fan_g))

    feat, out = jax.jit(importance_map_forward)(x, wt, bt, wg, bg)
    jax.block_until_ready((feat, out))

    assert feat.shape == (N, 6, 2 * H, 2 * W), feat.shape
    assert out.shape == (N, map_layers, 2 * H, 2 * W), out.shape

    feat_ref, out_ref = _ref_forward(x, wt, bt, wg, bg)
    assert jnp.allclose(feat, feat_ref, atol=1e-4, rtol=1e-4)
    assert jnp.allclose(out, out_ref, atol=1e-4, rtol=1e-4)

    print("KERNEL_OK")
</pallas_src>

<mosaic_0001>
module attributes {stable_mosaic.version = 11 : i64} {
  func.func @kernel(%arg0: i32, %arg1: memref<8x512xf32, #tpu.memory_space<vmem>>, %arg2: memref<16x512xf32, #tpu.memory_space<vmem>>, %arg3: memref<32x64xf32, #tpu.memory_space<vmem>>, %arg4: memref<32x1xf32, #tpu.memory_space<vmem>>, %arg5: memref<4x8x32xf32, #tpu.memory_space<vmem>>, %arg6: memref<8x1xf32, #tpu.memory_space<vmem>>, %arg7: memref<32x512xf32, #tpu.memory_space<vmem>>, %arg8: memref<8x512xf32, #tpu.memory_space<vmem>>) attributes {dimension_semantics = [#tpu.dimension_semantics<parallel>], iteration_bounds = array<i64: 1>, scalar_prefetch = 0 : i64, scratch_operands = 0 : i64, tpu.core_type = #tpu.core_type<tc>, window_params = [{pipeline_mode = #tpu.pipeline_mode<synchronous>, transform_indices = @transform_0, window_bounds = array<i64: 8, 512>}, {transform_indices = @transform_1, window_bounds = array<i64: 16, 512>}, {pipeline_mode = #tpu.pipeline_mode<synchronous>, transform_indices = @transform_2, window_bounds = array<i64: 32, 64>}, {pipeline_mode = #tpu.pipeline_mode<synchronous>, transform_indices = @transform_3, window_bounds = array<i64: 32, 1>}, {pipeline_mode = #tpu.pipeline_mode<synchronous>, transform_indices = @transform_4, window_bounds = array<i64: 4, 8, 32>}, {pipeline_mode = #tpu.pipeline_mode<synchronous>, transform_indices = @transform_5, window_bounds = array<i64: 8, 1>}, {transform_indices = @transform_6, window_bounds = array<i64: 32, 512>}, {transform_indices = @transform_7, window_bounds = array<i64: 8, 512>}]} {
    %c0 = arith.constant 0 : index
    %c0_0 = arith.constant 0 : index
    %0 = vector.load %arg1[%c0, %c0_0] : memref<8x512xf32, #tpu.memory_space<vmem>>, vector<1x512xf32>
    %c1 = arith.constant 1 : index
    %c0_1 = arith.constant 0 : index
    %1 = vector.load %arg1[%c1, %c0_1] : memref<8x512xf32, #tpu.memory_space<vmem>>, vector<1x512xf32>
    %c2 = arith.constant 2 : index
    %c0_2 = arith.constant 0 : index
    %2 = vector.load %arg1[%c2, %c0_2] : memref<8x512xf32, #tpu.memory_space<vmem>>, vector<1x512xf32>
    %c3 = arith.constant 3 : index
    %c0_3 = arith.constant 0 : index
    %3 = vector.load %arg1[%c3, %c0_3] : memref<8x512xf32, #tpu.memory_space<vmem>>, vector<1x512xf32>
    %c4 = arith.constant 4 : index
    %c0_4 = arith.constant 0 : index
    %4 = vector.load %arg1[%c4, %c0_4] : memref<8x512xf32, #tpu.memory_space<vmem>>, vector<1x512xf32>
    %c5 = arith.constant 5 : index
    %c0_5 = arith.constant 0 : index
    %5 = vector.load %arg1[%c5, %c0_5] : memref<8x512xf32, #tpu.memory_space<vmem>>, vector<1x512xf32>
    %c6 = arith.constant 6 : index
    %c0_6 = arith.constant 0 : index
    %6 = vector.load %arg1[%c6, %c0_6] : memref<8x512xf32, #tpu.memory_space<vmem>>, vector<1x512xf32>
    %c7 = arith.constant 7 : index
    %c0_7 = arith.constant 0 : index
    %7 = vector.load %arg1[%c7, %c0_7] : memref<8x512xf32, #tpu.memory_space<vmem>>, vector<1x512xf32>
    %c0_8 = arith.constant 0 : index
    %c0_9 = arith.constant 0 : index
    %8 = vector.load %arg2[%c0_8, %c0_9] : memref<16x512xf32, #tpu.memory_space<vmem>>, vector<16x512xf32>
    %c511_i32 = arith.constant 511 : i32
    %9 = tpu.dynamic_rotate %8 by %c511_i32 dim 1 : vector<16x512xf32>, i32 -> vector<16x512xf32>
    %10 = vector.broadcast %0 : vector<1x512xf32> to vector<16x512xf32>
    %11 = arith.mulf %9, %10 : vector<16x512xf32>
    %c496_i32 = arith.constant 496 : i32
    %12 = tpu.dynamic_rotate %8 by %c496_i32 dim 1 : vector<16x512xf32>, i32 -> vector<16x512xf32>
    %13 = vector.broadcast %2 : vector<1x512xf32> to vector<16x512xf32>
    %14 = arith.mulf %12, %13 : vector<16x512xf32>
    %c495_i32 = arith.constant 495 : i32
    %15 = tpu.dynamic_rotate %8 by %c495_i32 dim 1 : vector<16x512xf32>, i32 -> vector<16x512xf32>
    %16 = vector.broadcast %4 : vector<1x512xf32> to vector<16x512xf32>
    %17 = arith.mulf %15, %16 : vector<16x512xf32>
    %18 = tpu.concatenate %8, %11, %14, %17 in 0 : vector<16x512xf32>, vector<16x512xf32>, vector<16x512xf32>, vector<16x512xf32> -> vector<64x512xf32>
    %c0_10 = arith.constant 0 : index
    %c0_11 = arith.constant 0 : index
    %19 = vector.load %arg3[%c0_10, %c0_11] : memref<32x64xf32, #tpu.memory_space<vmem>>, vector<32x64xf32>
    %cst = arith.constant dense<0.000000e+00> : vector<32x512xf32>
    %20 = tpu.matmul %19, %18, %cst {dimension_numbers = #tpu.dot_dimension_numbers<[1], [0], [0], [1], [0, 0, 1, 1], [], []>} : vector<32x64xf32>, vector<64x512xf32>, vector<32x512xf32> -> vector<32x512xf32>
    %c0_12 = arith.constant 0 : index
    %c0_13 = arith.constant 0 : index
    %21 = vector.load %arg4[%c0_12, %c0_13] : memref<32x1xf32, #tpu.memory_space<vmem>>, vector<32x1xf32>
    %22 = vector.broadcast %21 : vector<32x1xf32> to vector<32x512xf32>
    %23 = arith.addf %20, %22 : vector<32x512xf32>
    %c0_14 = arith.constant 0 : index
    %c0_15 = arith.constant 0 : index
    %24 = vector.load %arg7[%c0_14, %c0_15] : memref<32x512xf32, #tpu.memory_space<vmem>>, vector<32x512xf32>
    tpu.vector_store %arg7[%c0_14, %c0_15], %23 {strides = array<i32>} : memref<32x512xf32, #tpu.memory_space<vmem>>, vector<32x512xf32>,
    %25 = vector.extract_strided_slice %23 {offsets = [0, 0], sizes = [8, 512], strides = [1, 1]} : vector<32x512xf32> to vector<8x512xf32>
    %c511_i32_16 = arith.constant 511 : i32
    %26 = tpu.dynamic_rotate %25 by %c511_i32_16 dim 1 : vector<8x512xf32>, i32 -> vector<8x512xf32>
    %27 = vector.broadcast %0 : vector<1x512xf32> to vector<8x512xf32>
    %28 = arith.mulf %26, %27 : vector<8x512xf32>
    %c496_i32_17 = arith.constant 496 : i32
    %29 = tpu.dynamic_rotate %25 by %c496_i32_17 dim 1 : vector<8x512xf32>, i32 -> vector<8x512xf32>
    %30 = vector.broadcast %2 : vector<1x512xf32> to vector<8x512xf32>
    %31 = arith.mulf %29, %30 : vector<8x512xf32>
    %c495_i32_18 = arith.constant 495 : i32
    %32 = tpu.dynamic_rotate %25 by %c495_i32_18 dim 1 : vector<8x512xf32>, i32 -> vector<8x512xf32>
    %33 = vector.broadcast %4 : vector<1x512xf32> to vector<8x512xf32>
    %34 = arith.mulf %32, %33 : vector<8x512xf32>
    %35 = tpu.concatenate %25, %28, %31, %34 in 0 : vector<8x512xf32>, vector<8x512xf32>, vector<8x512xf32>, vector<8x512xf32> -> vector<32x512xf32>
    %c0_19 = arith.constant 0 : index
    %c0_20 = arith.constant 0 : index
    %c0_21 = arith.constant 0 : index
    %36 = vector.load %arg5[%c0_19, %c0_20, %c0_21] : memref<4x8x32xf32, #tpu.memory_space<vmem>>, vector<1x8x32xf32>
    %37 = vector.shape_cast %36 : vector<1x8x32xf32> to vector<8x32xf32>
    %cst_22 = arith.constant dense<0.000000e+00> : vector<8x512xf32>
    %38 = tpu.matmul %37, %35, %cst_22 {dimension_numbers = #tpu.dot_dimension_numbers<[1], [0], [0], [1], [0, 0, 1, 1], [], []>} : vector<8x32xf32>, vector<32x512xf32>, vector<8x512xf32> -> vector<8x512xf32>
    %39 = vector.extract_strided_slice %23 {offsets = [8, 0], sizes = [8, 512], strides = [1, 1]} : vector<32x512xf32> to vector<8x512xf32>
    %c1_i32 = arith.constant 1 : i32
    %40 = tpu.dynamic_rotate %39 by %c1_i32 dim 1 : vector<8x512xf32>, i32 -> vector<8x512xf32>
    %41 = vector.broadcast %1 : vector<1x512xf32> to vector<8x512xf32>
    %42 = arith.mulf %40, %41 : vector<8x512xf32>
    %c497_i32 = arith.constant 497 : i32
    %43 = tpu.dynamic_rotate %39 by %c497_i32 dim 1 : vector<8x512xf32>, i32 -> vector<8x512xf32>
    %44 = vector.broadcast %5 : vector<1x512xf32> to vector<8x512xf32>
    %45 = arith.mulf %43, %44 : vector<8x512xf32>
    %c496_i32_23 = arith.constant 496 : i32
    %46 = tpu.dynamic_rotate %39 by %c496_i32_23 dim 1 : vector<8x512xf32>, i32 -> vector<8x512xf32>
    %47 = vector.broadcast %2 : vector<1x512xf32> to vector<8x512xf32>
    %48 = arith.mulf %46, %47 : vector<8x512xf32>
    %49 = tpu.concatenate %42, %39, %45, %48 in 0 : vector<8x512xf32>, vector<8x512xf32>, vector<8x512xf32>, vector<8x512xf32> -> vector<32x512xf32>
    %c1_24 = arith.constant 1 : index
    %c0_25 = arith.constant 0 : index
    %c0_26 = arith.constant 0 : index
    %50 = vector.load %arg5[%c1_24, %c0_25, %c0_26] : memref<4x8x32xf32, #tpu.memory_space<vmem>>, vector<1x8x32xf32>
    %51 = vector.shape_cast %50 : vector<1x8x32xf32> to vector<8x32xf32>
    %cst_27 = arith.constant dense<0.000000e+00> : vector<8x512xf32>
    %52 = tpu.matmul %51, %49, %cst_27 {dimension_numbers = #tpu.dot_dimension_numbers<[1], [0], [0], [1], [0, 0, 1, 1], [], []>} : vector<8x32xf32>, vector<32x512xf32>, vector<8x512xf32> -> vector<8x512xf32>
    %53 = arith.addf %38, %52 : vector<8x512xf32>
    %54 = vector.extract_strided_slice %23 {offsets = [16, 0], sizes = [8, 512], strides = [1, 1]} : vector<32x512xf32> to vector<8x512xf32>
    %c16_i32 = arith.constant 16 : i32
    %55 = tpu.dynamic_rotate %54 by %c16_i32 dim 1 : vector<8x512xf32>, i32 -> vector<8x512xf32>
    %56 = vector.broadcast %3 : vector<1x512xf32> to vector<8x512xf32>
    %57 = arith.mulf %55, %56 : vector<8x512xf32>
    %c15_i32 = arith.constant 15 : i32
    %58 = tpu.dynamic_rotate %54 by %c15_i32 dim 1 : vector<8x512xf32>, i32 -> vector<8x512xf32>
    %59 = vector.broadcast %6 : vector<1x512xf32> to vector<8x512xf32>
    %60 = arith.mulf %58, %59 : vector<8x512xf32>
    %c511_i32_28 = arith.constant 511 : i32
    %61 = tpu.dynamic_rotate %54 by %c511_i32_28 dim 1 : vector<8x512xf32>, i32 -> vector<8x512xf32>
    %62 = vector.broadcast %0 : vector<1x512xf32> to vector<8x512xf32>
    %63 = arith.mulf %61, %62 : vector<8x512xf32>
    %64 = tpu.concatenate %57, %60, %54, %63 in 0 : vector<8x512xf32>, vector<8x512xf32>, vector<8x512xf32>, vector<8x512xf32> -> vector<32x512xf32>
    %c2_29 = arith.constant 2 : index
    %c0_30 = arith.constant 0 : index
    %c0_31 = arith.constant 0 : index
    %65 = vector.load %arg5[%c2_29, %c0_30, %c0_31] : memref<4x8x32xf32, #tpu.memory_space<vmem>>, vector<1x8x32xf32>
    %66 = vector.shape_cast %65 : vector<1x8x32xf32> to vector<8x32xf32>
    %cst_32 = arith.constant dense<0.000000e+00> : vector<8x512xf32>
    %67 = tpu.matmul %66, %64, %cst_32 {dimension_numbers = #tpu.dot_dimension_numbers<[1], [0], [0], [1], [0, 0, 1, 1], [], []>} : vector<8x32xf32>, vector<32x512xf32>, vector<8x512xf32> -> vector<8x512xf32>
    %68 = arith.addf %53, %67 : vector<8x512xf32>
    %69 = vector.extract_strided_slice %23 {offsets = [24, 0], sizes = [8, 512], strides = [1, 1]} : vector<32x512xf32> to vector<8x512xf32>
    %c17_i32 = arith.constant 17 : i32
    %70 = tpu.dynamic_rotate %69 by %c17_i32 dim 1 : vector<8x512xf32>, i32 -> vector<8x512xf32>
    %71 = vector.broadcast %7 : vector<1x512xf32> to vector<8x512xf32>
    %72 = arith.mulf %70, %71 : vector<8x512xf32>
    %c16_i32_33 = arith.constant 16 : i32
    %73 = tpu.dynamic_rotate %69 by %c16_i32_33 dim 1 : vector<8x512xf32>, i32 -> vector<8x512xf32>
    %74 = vector.broadcast %3 : vector<1x512xf32> to vector<8x512xf32>
    %75 = arith.mulf %73, %74 : vector<8x512xf32>
    %c1_i32_34 = arith.constant 1 : i32
    %76 = tpu.dynamic_rotate %69 by %c1_i32_34 dim 1 : vector<8x512xf32>, i32 -> vector<8x512xf32>
    %77 = vector.broadcast %1 : vector<1x512xf32> to vector<8x512xf32>
    %78 = arith.mulf %76, %77 : vector<8x512xf32>
    %79 = tpu.concatenate %72, %75, %78, %69 in 0 : vector<8x512xf32>, vector<8x512xf32>, vector<8x512xf32>, vector<8x512xf32> -> vector<32x512xf32>
    %c3_35 = arith.constant 3 : index
    %c0_36 = arith.constant 0 : index
    %c0_37 = arith.constant 0 : index
    %80 = vector.load %arg5[%c3_35, %c0_36, %c0_37] : memref<4x8x32xf32, #tpu.memory_space<vmem>>, vector<1x8x32xf32>
    %81 = vector.shape_cast %80 : vector<1x8x32xf32> to vector<8x32xf32>
    %cst_38 = arith.constant dense<0.000000e+00> : vector<8x512xf32>
    %82 = tpu.matmul %81, %79, %cst_38 {dimension_numbers = #tpu.dot_dimension_numbers<[1], [0], [0], [1], [0, 0, 1, 1], [], []>} : vector<8x32xf32>, vector<32x512xf32>, vector<8x512xf32> -> vector<8x512xf32>
    %83 = arith.addf %68, %82 : vector<8x512xf32>
    %c0_39 = arith.constant 0 : index
    %c0_40 = arith.constant 0 : index
    %84 = vector.load %arg6[%c0_39, %c0_40] : memref<8x1xf32, #tpu.memory_space<vmem>>, vector<8x1xf32>
    %85 = vector.broadcast %84 : vector<8x1xf32> to vector<8x512xf32>
    %86 = arith.addf %83, %85 : vector<8x512xf32>
    %c0_41 = arith.constant 0 : index
    %c0_42 = arith.constant 0 : index
    %87 = vector.load %arg8[%c0_41, %c0_42] : memref<8x512xf32, #tpu.memory_space<vmem>>, vector<8x512xf32>
    tpu.vector_store %arg8[%c0_41, %c0_42], %86 {strides = array<i32>} : memref<8x512xf32, #tpu.memory_space<vmem>>, vector<8x512xf32>,
    return
  }
  func.func @transform_0(%arg0: i32) -> (i32, i32) {
    %c0_i32 = arith.constant 0 : i32
    %c0_i32_0 = arith.constant 0 : i32
    %c0_i32_1 = arith.constant 0 : i32
    return %c0_i32, %c0_i32_0 : i32, i32
  }
  func.func @transform_1(%arg0: i32) -> (i32, i32) {
    %c0_i32 = arith.constant 0 : i32
    %c0_i32_0 = arith.constant 0 : i32
    return %c0_i32, %arg0 : i32, i32
  }
  func.func @transform_2(%arg0: i32) -> (i32, i32) {
    %c0_i32 = arith.constant 0 : i32
    %c0_i32_0 = arith.constant 0 : i32
    %c0_i32_1 = arith.constant 0 : i32
    return %c0_i32, %c0_i32_0 : i32, i32
  }
  func.func @transform_3(%arg0: i32) -> (i32, i32) {
    %c0_i32 = arith.constant 0 : i32
    %c0_i32_0 = arith.constant 0 : i32
    %c0_i32_1 = arith.constant 0 : i32
    return %c0_i32, %c0_i32_0 : i32, i32
  }
  func.func @transform_4(%arg0: i32) -> (i32, i32, i32) {
    %c0_i32 = arith.constant 0 : i32
    %c0_i32_0 = arith.constant 0 : i32
    %c0_i32_1 = arith.constant 0 : i32
    %c0_i32_2 = arith.constant 0 : i32
    return %c0_i32, %c0_i32_0, %c0_i32_1 : i32, i32, i32
  }
  func.func @transform_5(%arg0: i32) -> (i32, i32) {
    %c0_i32 = arith.constant 0 : i32
    %c0_i32_0 = arith.constant 0 : i32
    %c0_i32_1 = arith.constant 0 : i32
    return %c0_i32, %c0_i32_0 : i32, i32
  }
  func.func @transform_6(%arg0: i32) -> (i32, i32) {
    %c0_i32 = arith.constant 0 : i32
    %c0_i32_0 = arith.constant 0 : i32
    return %c0_i32, %arg0 : i32, i32
  }
  func.func @transform_7(%arg0: i32) -> (i32, i32) {
    %c0_i32 = arith.constant 0 : i32
    %c0_i32_0 = arith.constant 0 : i32
    return %c0_i32, %arg0 : i32, i32
  }
}

</mosaic_0001>

<bundles_post_ra>
// kernel: importance_map_forward.1
= control target key start
LH: loop header
LB: loop body
LE: loop exit
PB: predicated region body
PF: predicated region fallthrough
CT: control target
= control target key end

     0   :  { %s1513_s30 = smov 127   ;;  %s1514_s18 = smov 112   ;;  %v2248_v12 = vmov 0.0   ;;  %v1517_v13 = vmov 0   ;;  %v64_v18 = vlaneseq  ;;  %vm240_vm3 = vcmask 523264   ;;  %s2240_s1 = inlined_call_operand.vmem [shape: f32[16,512], index: 1, kind: input, shape index: {}]   ;;  %s2241_s3 = inlined_call_operand.vmem [shape: f32[32,1], index: 3, kind: input, shape index: {}]   ;;  %s2242_s0 = inlined_call_operand.vmem [shape: f32[8,512], index: 0, kind: input, shape index: {}]   ;;  %s2243_s2 = inlined_call_operand.vmem [shape: f32[32,64], index: 2, kind: input, shape index: {}]   ;;  %s2244_s6 = inlined_call_operand.vmem [shape: f32[32,512], index: 6, kind: output, shape index: {0}]   ;;  %s2245_s5 = inlined_call_operand.vmem [shape: f32[8,1], index: 5, kind: input, shape index: {}]   ;;  %s2246_s4 = inlined_call_operand.vmem [shape: f32[4,8,32], index: 4, kind: input, shape index: {}]   ;;  %s2247_s7 = inlined_call_operand.vmem [shape: f32[8,512], index: 7, kind: output, shape index: {1}]  }
   0x1   :  { %v41_v0 = vld [vmem:[%s2240_s1 + $0x8] sm:$0xff]  ;;  %v40_v1 = vld [vmem:[%s2240_s1] sm:$0xff]  ;;  %v47_v5 = vld [vmem:[%s2240_s1 + $0x38] sm:$0xff]  ;;  %317 = vmatprep.mubr.f32.mxu0 %v2248_v12  ;;  %406 = vmatprep.mubr.f32.mxu1 %v2248_v12  ;;  %s1518_s27 = smov 1   ;;  %s1521_s28 = smov 15   ;;  %vm590_vm6 = vcmask 261120  }
   0x2   :  { %v45_v2 = vld [vmem:[%s2240_s1 + $0x28] sm:$0xff]  ;;  %52 = vrot.lane.b32.xlu1 %v41_v0, %s1513_s30  ;;  %48 = vrot.lane.b32.xlu0 %v40_v1, %s1513_s30  ;;  %v44_v3 = vld [vmem:[%s2240_s1 + $0x20] sm:$0xff]  ;;  %v77_v19 = vshrl.u32 %v64_v18, 7  ;;  %v1625_v21 = vand.u32 127, %v64_v18 }
   0x3   :  { %v1393_v4 = vpack.c.bf16 %v45_v2, %v41_v0  ;;  %v43_v6 = vld [vmem:[%s2240_s1 + $0x18] sm:$0xff]  ;;  %v1395_v7 = vpack.c.bf16 %v44_v3, %v40_v1  ;;  %v46_v8 = vld [vmem:[%s2240_s1 + $0x30] sm:$0xff]  ;;  %1512 = vset.pattern.permute.xlu1 %v1517_v13  ;;  %v216_v14 = vld [vmem:[%s2241_s3] sm:$0xff]  ;;  %1511 = vset.pattern.permute.xlu0 %v1517_v13 }
   0x4   :  { %v42_v9 = vld [vmem:[%s2240_s1 + $0x10] sm:$0xff]  ;;  %v1409_v10 = vpack.c.bf16 %v47_v5, %v43_v6  ;;  %s1515_s1 = smov 111   ;;  %v217_v15 = vld [vmem:[%s2241_s3 + $0x8] sm:$0xff]  ;;  %v219_v17 = vld [vmem:[%s2241_s3 + $0x18] sm:$0xff]  ;;  %v1627_v23 = vsub.s32 0, %v77_v19  ;;  %v1629_v24 = vsub.s32 1, %v77_v19 }
   0x5   :  { %1394 = vmatprep.subr.bf16.mxu0 %v1393_v4  ;;  %v1411_v11 = vpack.c.bf16 %v46_v8, %v42_v9  ;;  %v218_v16 = vld [vmem:[%s2241_s3 + $0x10] sm:$0xff]  ;;  %vm66_vm0 = vcmp.lt.s32.totalorder %v1625_v21, 127  ;;  %v1637_v29 = vsub.s32 2, %v77_v19  ;;  %v1645_v32 = vsub.s32 3, %v77_v19 }
   0x6   :  { %1396 = vmatpush1.bf16.msra.mxu0 %v1395_v7  ;;  %54 = vrot.lane.b32.xlu1 %v45_v2, %s1513_s30  ;;  %v25_v25 = vld [vmem:[%s2242_s0] ss:$8 sm:$0xf]  ;;  %v1368_v60 = vld [vmem:[%s2242_s0 + $0x2] ss:$8 sm:$0xf] }
   0x7   :  { %50 = vrot.lane.b32.xlu0 %v44_v3, %s1513_s30  ;;  %1410 = vmatprep.subr.bf16.mxu1 %v1409_v10  ;;  %v1640_v30 = vrot.slane %v25_v25, %v1627_v23  ;;  %v1643_v31 = vrot.slane %v25_v25, %v1629_v24  ;;  %v1655_v39 = vrot.slane %v25_v25, %v1637_v29  ;;  %vm120_vm1 = vcmp.lt.s32.totalorder %v1625_v21, 112 }
   0x8   :  { %1412 = vmatpush1.bf16.msra.mxu1 %v1411_v11  ;;  %v1661_v43 = vrot.slane %v25_v25, %v1645_v32  ;;  %v1680_v62 = vrot.slane %v1368_v60, %v1627_v23  ;;  %v1698_v11 = vrot.slane %v1368_v60, %v1637_v29  ;;  %v1701_v13 = vrot.slane %v1368_v60, %v1645_v32 }
   0x9   :  { %vm174_vm2 = vcmp.lt.s32.totalorder %v1625_v21, 111  ;;  %vm504_vm4 = vcmp.lt.s32.totalorder %v1625_v21, 1  ;;  %vm542_vm5 = vcmp.lt.s32.totalorder %v1625_v21, 113  ;;  %vm889_vm7 = vcmp.lt.s32.totalorder %v1625_v21, 16 }
   0xa   :  { %58 = vrot.lane.b32.xlu1 %v46_v8, %s1513_s30  ;;  %vm927_vm8 = vcmp.lt.s32.totalorder %v1625_v21, 15  ;;  %vm1132_vm9 = vcmp.lt.s32.totalorder %v1625_v21, 17 }
   0xb   :  { %56 = vrot.lane.b32.xlu0 %v42_v9, %s1513_s30 }
   0xe   :  { %62 = vrot.lane.b32.xlu1 %v47_v5, %s1513_s30 }
   0xf   :  { %60 = vrot.lane.b32.xlu0 %v43_v6, %s1513_s30 }
  0x12   :  { %106 = vrot.lane.b32.xlu1 %v44_v3, %s1514_s18 }
  0x13   :  { %104 = vrot.lane.b32.xlu0 %v40_v1, %s1514_s18 }
  0x16   :  { %110 = vrot.lane.b32.xlu1 %v45_v2, %s1514_s18 }
  0x17   :  { %108 = vrot.lane.b32.xlu0 %v41_v0, %s1514_s18 }
  0x1a   :  { %114 = vrot.lane.b32.xlu1 %v46_v8, %s1514_s18 }
  0x1b   :  { %112 = vrot.lane.b32.xlu0 %v42_v9, %s1514_s18 }
  0x1e   :  { %118 = vrot.lane.b32.xlu1 %v47_v5, %s1514_s18 }
  0x1f   :  { %116 = vrot.lane.b32.xlu0 %v43_v6, %s1514_s18 }
  0x22   :  { %160 = vrot.lane.b32.xlu1 %v44_v3, %s1515_s1 }
  0x23   :  { %158 = vrot.lane.b32.xlu0 %v40_v1, %s1515_s1 }
  0x26   :  { %164 = vrot.lane.b32.xlu1 %v45_v2, %s1515_s1  ;;  %v1687_v2 = vrot.slane %v1368_v60, %v1629_v24 }
  0x27   :  { %162 = vrot.lane.b32.xlu0 %v41_v0, %s1515_s1 }
  0x2a   :  { %168 = vrot.lane.b32.xlu1 %v46_v8, %s1515_s1 }
  0x2b   :  { %166 = vrot.lane.b32.xlu0 %v42_v9, %s1515_s1 }
  0x2e   :  { %172 = vrot.lane.b32.xlu1 %v47_v5, %s1515_s1 }
  0x2f   :  { %170 = vrot.lane.b32.xlu0 %v43_v6, %s1515_s1 }
  0x32   :  { %222 = vperm.xlu1 %1512, %v216_v14  }
  0x33   :  { %227 = vperm.xlu0 %1511, %v217_v15  }
  0x36   :  { %232 = vperm.xlu1 %1512, %v218_v16  }
  0x37   :  { %237 = vperm.xlu0 %1511, %v219_v17  }
  0x74   :  { %v53_v20 = vpop.permute.xlu1 %52  ;;  %v49_v22 = vpop.permute.xlu0 %48 }
  0x75   :  { %v71_v33 = vsel %vm66_vm0, %v49_v22, %v53_v20 }
  0x76   :  { %v96_v40 = vmul.f32 %v1640_v30, %v71_v33 }
  0x78   :  { %v55_v26 = vpop.permute.xlu1 %54 }
  0x79   :  { %v51_v27 = vpop.permute.xlu0 %50 }
  0x7a   :  { %v72_v28 = vsel %vm66_vm0, %v51_v27, %v55_v26 }
  0x7b   :  { %v100_v34 = vmul.f32 %v1640_v30, %v72_v28 }
  0x7c   :  { %v59_v35 = vpop.permute.xlu1 %58 }
  0x7d   :  { %v57_v36 = vpop.permute.xlu0 %56  ;;  %v70_v37 = vsel %vm66_vm0, %v55_v26, %v59_v35  ;;  %v1399_v47 = vpack.c.bf16 %v100_v34, %v96_v40 }
  0x7e   :  { %v69_v38 = vsel %vm66_vm0, %v53_v20, %v57_v36  ;;  %v101_v41 = vmul.f32 %v1643_v31, %v70_v37  ;;  %v1370_v37 = vld [vmem:[%s2242_s0 + $0x4] ss:$8 sm:$0xf] }
  0x7f   :  { %v97_v42 = vmul.f32 %v1643_v31, %v69_v38  ;;  %v1720_v40 = vrot.slane %v1370_v37, %v1627_v23 }
  0x80   :  { %v63_v44 = vpop.permute.xlu1 %62 }
  0x81   :  { %v61_v45 = vpop.permute.xlu0 %60  ;;  %v1397_v46 = vpack.c.bf16 %v101_v41, %v97_v42  ;;  %v68_v48 = vsel %vm66_vm0, %v59_v35, %v63_v44  ;;  %v74_v49 = vsel %vm66_vm0, %v63_v44, %v51_v27 }
  0x82   :  { %v67_v50 = vsel %vm66_vm0, %v57_v36, %v61_v45  ;;  %v73_v51 = vsel %vm66_vm0, %v61_v45, %v49_v22  ;;  %v102_v52 = vmul.f32 %v1655_v39, %v68_v48  ;;  %v103_v53 = vmul.f32 %v1661_v43, %v74_v49 }
  0x83   :  { %v98_v54 = vmul.f32 %v1655_v39, %v67_v50  ;;  %v99_v55 = vmul.f32 %v1661_v43, %v73_v51  ;;  %1398 = vmatprep.subr.bf16.mxu0 %v1397_v46  ;;  %v1727_v45 = vrot.slane %v1370_v37, %v1629_v24 }
  0x84   :  { %1400 = vmatpush1.bf16.msra.mxu0 %v1399_v47  ;;  %v107_v56 = vpop.permute.xlu1 %106 }
  0x85   :  { %v105_v57 = vpop.permute.xlu0 %104  ;;  %v1413_v58 = vpack.c.bf16 %v103_v53, %v99_v55  ;;  %v1415_v59 = vpack.c.bf16 %v102_v52, %v98_v54  ;;  %v1738_v54 = vrot.slane %v1370_v37, %v1637_v29  ;;  %v1741_v55 = vrot.slane %v1370_v37, %v1645_v32 }
  0x87   :  { %1414 = vmatprep.subr.bf16.mxu1 %v1413_v58 }
  0x88   :  { %1416 = vmatpush1.bf16.msra.mxu1 %v1415_v59  ;;  %v111_v61 = vpop.permute.xlu1 %110 }
  0x89   :  { %v109_v63 = vpop.permute.xlu0 %108  ;;  %v126_v0 = vsel %vm120_vm1, %v107_v56, %v111_v61 }
  0x8a   :  { %v125_v1 = vsel %vm120_vm1, %v105_v57, %v109_v63  ;;  %v154_v3 = vmul.f32 %v1680_v62, %v126_v0 }
  0x8b   :  { %v150_v4 = vmul.f32 %v1680_v62, %v125_v1 }
  0x8c   :  { %v115_v5 = vpop.permute.xlu1 %114 }
  0x8d   :  { %v113_v6 = vpop.permute.xlu0 %112  ;;  %v124_v7 = vsel %vm120_vm1, %v111_v61, %v115_v5  ;;  %v1403_v17 = vpack.c.bf16 %v154_v3, %v150_v4 }
  0x8e   :  { %v123_v8 = vsel %vm120_vm1, %v109_v63, %v113_v6  ;;  %v155_v9 = vmul.f32 %v1687_v2, %v124_v7 }
  0x8f   :  { %v151_v10 = vmul.f32 %v1687_v2, %v123_v8 }
  0x90   :  { %v119_v14 = vpop.permute.xlu1 %118 }
  0x91   :  { %v117_v15 = vpop.permute.xlu0 %116  ;;  %v1401_v16 = vpack.c.bf16 %v155_v9, %v151_v10  ;;  %v122_v18 = vsel %vm120_vm1, %v115_v5, %v119_v14  ;;  %v128_v19 = vsel %vm120_vm1, %v119_v14, %v107_v56  ;;  %v213_v9 = vld [vmem:[%s2243_s2 + $0x8] sm:$0xff]  ;;  %v214_v10 = vld [vmem:[%s2243_s2 + $0x10] sm:$0xff]  ;;  %v215_v14 = vld [vmem:[%s2243_s2 + $0x18] sm:$0xff] }
  0x92   :  { %v121_v20 = vsel %vm120_vm1, %v113_v6, %v117_v15  ;;  %v127_v22 = vsel %vm120_vm1, %v117_v15, %v105_v57  ;;  %v156_v25 = vmul.f32 %v1698_v11, %v122_v18  ;;  %v157_v26 = vmul.f32 %v1701_v13, %v128_v19  ;;  %v212_v6 = vld [vmem:[%s2243_s2] sm:$0xff] }
  0x93   :  { %v152_v27 = vmul.f32 %v1698_v11, %v121_v20  ;;  %v153_v28 = vmul.f32 %v1701_v13, %v127_v22  ;;  %1402 = vmatprep.subr.bf16.mxu0 %v1401_v16 }
  0x94   :  { %1404 = vmatpush1.bf16.msra.mxu0 %v1403_v17  ;;  %v161_v33 = vpop.permute.xlu1 %160 }
  0x95   :  { %v159_v34 = vpop.permute.xlu0 %158  ;;  %v1417_v35 = vpack.c.bf16 %v157_v26, %v153_v28  ;;  %v1419_v36 = vpack.c.bf16 %v156_v25, %v152_v27 }
  0x97   :  { %1418 = vmatprep.subr.bf16.mxu1 %v1417_v35 }
  0x98   :  { %1420 = vmatpush1.bf16.msra.mxu1 %v1419_v36  ;;  %v165_v38 = vpop.permute.xlu1 %164 }
  0x99   :  { %v163_v41 = vpop.permute.xlu0 %162  ;;  %v180_v42 = vsel %vm174_vm2, %v161_v33, %v165_v38 }
  0x9a   :  { %v179_v44 = vsel %vm174_vm2, %v159_v34, %v163_v41  ;;  %v208_v46 = vmul.f32 %v1720_v40, %v180_v42 }
  0x9b   :  { %v204_v47 = vmul.f32 %v1720_v40, %v179_v44 }
  0x9c   :  { %v169_v48 = vpop.permute.xlu1 %168 }
  0x9d   :  { %v167_v49 = vpop.permute.xlu0 %166  ;;  %v178_v50 = vsel %vm174_vm2, %v165_v38, %v169_v48  ;;  %v1407_v59 = vpack.c.bf16 %v208_v46, %v204_v47 }
  0x9e   :  { %v177_v51 = vsel %vm174_vm2, %v163_v41, %v167_v49  ;;  %v209_v52 = vmul.f32 %v1727_v45, %v178_v50 }
  0x9f   :  { %v205_v53 = vmul.f32 %v1727_v45, %v177_v51 }
  0xa0   :  { %v173_v56 = vpop.permute.xlu1 %172 }
  0xa1   :  { %v171_v57 = vpop.permute.xlu0 %170  ;;  %v1405_v58 = vpack.c.bf16 %v209_v52, %v205_v53  ;;  %v176_v60 = vsel %vm174_vm2, %v169_v48, %v173_v56  ;;  %v182_v61 = vsel %vm174_vm2, %v173_v56, %v161_v33 }
  0xa2   :  { %v175_v63 = vsel %vm174_vm2, %v167_v49, %v171_v57  ;;  %v181_v0 = vsel %vm174_vm2, %v171_v57, %v159_v34  ;;  %v210_v1 = vmul.f32 %v1738_v54, %v176_v60  ;;  %v211_v3 = vmul.f32 %v1741_v55, %v182_v61 }
  0xa3   :  { %v206_v4 = vmul.f32 %v1738_v54, %v175_v63  ;;  %v207_v5 = vmul.f32 %v1741_v55, %v181_v0  ;;  %1406 = vmatprep.subr.bf16.mxu0 %v1405_v58 }
  0xa4   :  { %1408 = vmatpush1.bf16.msra.mxu0 %v1407_v59 }
  0xa5   :  { %v1421_v7 = vpack.c.bf16 %v211_v3, %v207_v5  ;;  %v1423_v8 = vpack.c.bf16 %v210_v1, %v206_v4  ;;  %v1345_v1 = vld [vmem:[%s2245_s5] sm:$0xff] }
  0xa7   :  { %1374 = vmatmul.mubr.msk.f32.vlgmr.msra.gmra.mrb[0].mxu0 %vm240_vm3, %v212_v6  ;;  %1422 = vmatprep.subr.bf16.mxu1 %v1421_v7 }
  0xa8   :  { %1424 = vmatpush1.bf16.msra.mxu1 %v1423_v8  ;;  %323 = vmatprep.mubr.f32.mxu0 %v2248_v12 }
  0xab   :  { %1375 = vmatmul.mubr.msk.f32.gmra.mrb[2].mxu0 %vm240_vm3, %v213_v9  ;;  %1378 = vmatmul.mubr.msk.f32.vlgmr.msra.gmra.mrb[0].mxu1 %vm240_vm3, %v212_v6 }
  0xac   :  { %329 = vmatprep.mubr.f32.mxu0 %v2248_v12  ;;  %412 = vmatprep.mubr.f32.mxu1 %v2248_v12 }
  0xaf   :  { %1376 = vmatmul.mubr.msk.f32.gmra.mrb[4].mxu0 %vm240_vm3, %v214_v10  ;;  %1379 = vmatmul.mubr.msk.f32.gmra.mrb[2].mxu1 %vm240_vm3, %v213_v9 }
  0xb0   :  { %418 = vmatprep.mubr.f32.mxu1 %v2248_v12  ;;  %335 = vmatprep.mubr.f32.mxu0 %v2248_v12 }
  0xb1   :  { %v223_v15 = vpop.permute.xlu1 %222 }
  0xb2   :  { %v228_v20 = vpop.permute.xlu0 %227 }
  0xb3   :  { %1380 = vmatmul.mubr.msk.f32.gmra.mrb[4].mxu1 %vm240_vm3, %v214_v10  ;;  %1377 = vmatmul.mubr.msk.f32.gmra.mrb[6].mxu0 %vm240_vm3, %v215_v14 }
  0xb4   :  { %424 = vmatprep.mubr.f32.mxu1 %v2248_v12  ;;  %658 = vmatprep.mubr.f32.mxu0 %v2248_v12 }
  0xb5   :  { %v233_v36 = vpop.permute.xlu1 %232 }
  0xb6   :  { %v238_v49 = vpop.permute.xlu0 %237 }
  0xb7   :  { %1381 = vmatmul.mubr.msk.f32.gmra.mrb[6].mxu1 %vm240_vm3, %v215_v14 }
  0xb8   :  { %729 = vmatprep.mubr.f32.mxu1 %v2248_v12 }
 0x17a   :  { %v319_v16 = vpop.f32.mrb[0].mxu0 }
 0x17b   :  { %v1783_v17 = vadd.f32 %v319_v16, %v223_v15  ;;  %v321_v18 = vpop.f32.mrb[1].mxu0 }
 0x17c   :  { %v1785_v19 = vadd.f32 %v321_v18, %v223_v15  ;;  %v1367_v18 = vld [vmem:[%s2242_s0 + $0x1] ss:$8 sm:$0xf] }
 0x17d   :  { %431 = vst [vmem:[%s2244_s6] sm:$0xff] %v1783_v17  ;;  %447 = vrot.lane.b32.xlu1 %v1783_v17, %s1513_s30 }
 0x17e   :  { %432 = vst [vmem:[%s2244_s6 + $0x8] sm:$0xff] %v1785_v19  ;;  %v408_v22 = vpop.f32.mrb[0].mxu1  ;;  %449 = vrot.lane.b32.xlu0 %v1785_v19, %s1513_s30  ;;  %v325_v25 = vpop.f32.mrb[2].mxu0 }
 0x17f   :  { %v1799_v26 = vadd.f32 %v408_v22, %v223_v15  ;;  %v410_v27 = vpop.f32.mrb[1].mxu1  ;;  %v327_v28 = vpop.f32.mrb[3].mxu0  ;;  %v1801_v33 = vadd.f32 %v325_v25, %v228_v20  ;;  %v1979_v22 = vrot.slane %v1367_v18, %v1629_v24 }
 0x180   :  { %v1803_v34 = vadd.f32 %v410_v27, %v223_v15  ;;  %v1805_v35 = vadd.f32 %v327_v28, %v228_v20 }
 0x181   :  { %433 = vst [vmem:[%s2244_s6 + $0x10] sm:$0xff] %v1799_v26  ;;  %451 = vrot.lane.b32.xlu1 %v1799_v26, %s1513_s30  ;;  %435 = vst [vmem:[%s2244_s6 + $0x20] sm:$0xff] %v1801_v33 }
 0x182   :  { %434 = vst [vmem:[%s2244_s6 + $0x18] sm:$0xff] %v1803_v34  ;;  %v331_v37 = vpop.f32.mrb[4].mxu0  ;;  %453 = vrot.lane.b32.xlu0 %v1803_v34, %s1513_s30  ;;  %v414_v38 = vpop.f32.mrb[2].mxu1  ;;  %436 = vst [vmem:[%s2244_s6 + $0x28] sm:$0xff] %v1805_v35 }
 0x183   :  { %v1827_v41 = vadd.f32 %v331_v37, %v233_v36  ;;  %v333_v42 = vpop.f32.mrb[5].mxu0  ;;  %v416_v44 = vpop.f32.mrb[3].mxu1  ;;  %v1829_v46 = vadd.f32 %v414_v38, %v228_v20  ;;  %v1988_v38 = vrot.slane %v1367_v18, %v1627_v23 }
 0x184   :  { %v1831_v47 = vadd.f32 %v333_v42, %v233_v36  ;;  %v1833_v48 = vadd.f32 %v416_v44, %v228_v20  ;;  %v1991_v42 = vrot.slane %v1367_v18, %v1645_v32 }
 0x185   :  { %439 = vst [vmem:[%s2244_s6 + $0x40] sm:$0xff] %v1827_v41  ;;  %463 = vrot.lane.b32.xlu1 %v1783_v17, %s1514_s18  ;;  %437 = vst [vmem:[%s2244_s6 + $0x30] sm:$0xff] %v1829_v46 }
 0x186   :  { %440 = vst [vmem:[%s2244_s6 + $0x48] sm:$0xff] %v1831_v47  ;;  %v420_v50 = vpop.f32.mrb[4].mxu1  ;;  %465 = vrot.lane.b32.xlu0 %v1785_v19, %s1514_s18  ;;  %438 = vst [vmem:[%s2244_s6 + $0x38] sm:$0xff] %v1833_v48  ;;  %v337_v51 = vpop.f32.mrb[6].mxu0 }
 0x187   :  { %v1855_v52 = vadd.f32 %v420_v50, %v233_v36  ;;  %v422_v53 = vpop.f32.mrb[5].mxu1  ;;  %v1857_v56 = vadd.f32 %v337_v51, %v238_v49  ;;  %v339_v57 = vpop.f32.mrb[7].mxu0  ;;  %2258 = vst [vmem:[#allocation5_spill] sm:$0xff] %v1988_v38  ;;  %2259 = vst [vmem:[#allocation6_spill] sm:$0xff] %v1991_v42 }
 0x188   :  { %v1859_v58 = vadd.f32 %v422_v53, %v233_v36  ;;  %v1861_v59 = vadd.f32 %v339_v57, %v238_v49  ;;  %v1984_v36 = vrot.slane %v1367_v18, %v1637_v29 }
 0x189   :  { %2255 = vst [vmem:[#allocation2_spill] sm:$0xff] %v1857_v56  ;;  %441 = vst [vmem:[%s2244_s6 + $0x50] sm:$0xff] %v1855_v52  ;;  %467 = vrot.lane.b32.xlu1 %v1799_v26, %s1514_s18 }
 0x18a   :  { %443 = vst [vmem:[%s2244_s6 + $0x60] sm:$0xff] %v1857_v56  ;;  %442 = vst [vmem:[%s2244_s6 + $0x58] sm:$0xff] %v1859_v58  ;;  %469 = vrot.lane.b32.xlu0 %v1803_v34, %s1514_s18  ;;  %v426_v60 = vpop.f32.mrb[6].mxu1 }
 0x18b   :  { %444 = vst [vmem:[%s2244_s6 + $0x68] sm:$0xff] %v1861_v59  ;;  %v1883_v61 = vadd.f32 %v426_v60, %v238_v49  ;;  %v428_v63 = vpop.f32.mrb[7].mxu1 }
 0x18c   :  { %v1885_v0 = vadd.f32 %v428_v63, %v238_v49 }
 0x18d   :  { %2256 = vst [vmem:[#allocation3_spill] sm:$0xff] %v1883_v61  ;;  %479 = vrot.lane.b32.xlu1 %v1783_v17, %s1515_s1  ;;  %445 = vst [vmem:[%s2244_s6 + $0x70] sm:$0xff] %v1883_v61 }
 0x18e   :  { %2257 = vst [vmem:[#allocation4_spill] sm:$0xff] %v1885_v0  ;;  %481 = vrot.lane.b32.xlu0 %v1785_v19, %s1515_s1  ;;  %446 = vst [vmem:[%s2244_s6 + $0x78] sm:$0xff] %v1885_v0  ;;  %s1519_s6 = smov 113  }
 0x191   :  { %483 = vrot.lane.b32.xlu1 %v1799_v26, %s1515_s1 }
 0x192   :  { %485 = vrot.lane.b32.xlu0 %v1803_v34, %s1515_s1  ;;  %s1520_s1 = smov 16  }
 0x195   :  { %496 = vrot.lane.b32.xlu1 %v1801_v33, %s1518_s27 }
 0x196   :  { %498 = vrot.lane.b32.xlu0 %v1805_v35, %s1518_s27 }
 0x199   :  { %500 = vrot.lane.b32.xlu1 %v1829_v46, %s1518_s27 }
 0x19a   :  { %502 = vrot.lane.b32.xlu0 %v1833_v48, %s1518_s27 }
 0x19d   :  { %534 = vrot.lane.b32.xlu1 %v1801_v33, %s1519_s6 }
 0x19e   :  { %536 = vrot.lane.b32.xlu0 %v1805_v35, %s1519_s6 }
 0x1a1   :  { %538 = vrot.lane.b32.xlu1 %v1829_v46, %s1519_s6 }
 0x1a2   :  { %540 = vrot.lane.b32.xlu0 %v1833_v48, %s1519_s6 }
 0x1a5   :  { %572 = vrot.lane.b32.xlu1 %v1801_v33, %s1514_s18 }
 0x1a6   :  { %574 = vrot.lane.b32.xlu0 %v1805_v35, %s1514_s18 }
 0x1a9   :  { %576 = vrot.lane.b32.xlu1 %v1829_v46, %s1514_s18 }
 0x1aa   :  { %578 = vrot.lane.b32.xlu0 %v1833_v48, %s1514_s18  ;;  %s1522_s18 = smov 17  }
 0x1ad   :  { %881 = vrot.lane.b32.xlu1 %v1827_v41, %s1520_s1 }
 0x1ae   :  { %883 = vrot.lane.b32.xlu0 %v1831_v47, %s1520_s1 }
 0x1b1   :  { %885 = vrot.lane.b32.xlu1 %v1855_v52, %s1520_s1 }
 0x1b2   :  { %887 = vrot.lane.b32.xlu0 %v1859_v58, %s1520_s1 }
 0x1b5   :  { %919 = vrot.lane.b32.xlu1 %v1827_v41, %s1521_s28 }
 0x1b6   :  { %921 = vrot.lane.b32.xlu0 %v1831_v47, %s1521_s28 }
 0x1b9   :  { %923 = vrot.lane.b32.xlu1 %v1855_v52, %s1521_s28 }
 0x1ba   :  { %925 = vrot.lane.b32.xlu0 %v1859_v58, %s1521_s28 }
 0x1bd   :  { %957 = vrot.lane.b32.xlu1 %v1827_v41, %s1513_s30 }
 0x1be   :  { %959 = vrot.lane.b32.xlu0 %v1831_v47, %s1513_s30 }
 0x1c1   :  { %961 = vrot.lane.b32.xlu1 %v1855_v52, %s1513_s30 }
 0x1c2   :  { %963 = vrot.lane.b32.xlu0 %v1859_v58, %s1513_s30 }
 0x1c5   :  { %1124 = vrot.lane.b32.xlu1 %v1857_v56, %s1522_s18 }
 0x1c6   :  { %1126 = vrot.lane.b32.xlu0 %v1861_v59, %s1522_s18 }
 0x1c9   :  { %1128 = vrot.lane.b32.xlu1 %v1883_v61, %s1522_s18 }
 0x1ca   :  { %1130 = vrot.lane.b32.xlu0 %v1885_v0, %s1522_s18 }
 0x1cd   :  { %1162 = vrot.lane.b32.xlu1 %v1857_v56, %s1520_s1 }
 0x1ce   :  { %1164 = vrot.lane.b32.xlu0 %v1861_v59, %s1520_s1 }
 0x1d1   :  { %1166 = vrot.lane.b32.xlu1 %v1883_v61, %s1520_s1 }
 0x1d2   :  { %1168 = vrot.lane.b32.xlu0 %v1885_v0, %s1520_s1 }
 0x1d5   :  { %1178 = vrot.lane.b32.xlu1 %v1857_v56, %s1518_s27 }
 0x1d6   :  { %1180 = vrot.lane.b32.xlu0 %v1861_v59, %s1518_s27 }
 0x1d9   :  { %1182 = vrot.lane.b32.xlu1 %v1883_v61, %s1518_s27 }
 0x1da   :  { %1184 = vrot.lane.b32.xlu0 %v1885_v0, %s1518_s27 }
 0x1dd   :  { %1348 = vperm.xlu1 %1512, %v1345_v1  }
 0x1ef   :  { %v448_v3 = vpop.permute.xlu1 %447 }
 0x1f0   :  { %v450_v4 = vpop.permute.xlu0 %449 }
 0x1f3   :  { %v452_v5 = vpop.permute.xlu1 %451 }
 0x1f4   :  { %v454_v6 = vpop.permute.xlu0 %453 }
 0x1f7   :  { %v1958_v7 = vpop.permute.xlu1 %463 }
 0x1f8   :  { %v1960_v8 = vpop.permute.xlu0 %465 }
 0x1fb   :  { %v1962_v9 = vpop.permute.xlu1 %467 }
 0x1fc   :  { %v1964_v10 = vpop.permute.xlu0 %469 }
 0x1ff   :  { %v1966_v14 = vpop.permute.xlu1 %479 }
 0x200   :  { %v1968_v15 = vpop.permute.xlu0 %481 }
 0x203   :  { %v1970_v16 = vpop.permute.xlu1 %483 }
 0x204   :  { %v1975_v20 = vpop.permute.xlu0 %485 }
 0x207   :  { %v497_v25 = vpop.permute.xlu1 %496 }
 0x208   :  { %v499_v27 = vpop.permute.xlu0 %498 }
 0x209   :  { %v507_v28 = vsel %vm504_vm4, %v497_v25, %v499_v27 }
 0x20a   :  { %v531_v37 = vmul.f32 %v1979_v22, %v507_v28 }
 0x20b   :  { %v501_v44 = vpop.permute.xlu1 %500 }
 0x20c   :  { %v506_v49 = vsel %vm504_vm4, %v499_v27, %v501_v44  ;;  %v503_v50 = vpop.permute.xlu0 %502  ;;  %v1425_v51 = vpack.c.bf16 %v1805_v35, %v531_v37 }
 0x20d   :  { %v532_v53 = vmul.f32 %v1984_v36, %v506_v49  ;;  %v505_v57 = vsel %vm504_vm4, %v501_v44, %v503_v50  ;;  %v508_v60 = vsel %vm504_vm4, %v503_v50, %v497_v25  ;;  %v1371_v25 = vld [vmem:[%s2242_s0 + $0x5] ss:$8 sm:$0xf]  ;;  %v456_v49 = vsel %vm66_vm0, %v450_v4, %v452_v5 }
 0x20e   :  { %v530_v63 = vmul.f32 %v1988_v38, %v508_v60  ;;  %v533_v1 = vmul.f32 %v1991_v42, %v505_v57  ;;  %1426 = vmatprep.subr.bf16.mxu0 %v1425_v51  ;;  %v555_v51 = vrot.slane %v1371_v25, %v1629_v24  ;;  %v457_v60 = vsel %vm66_vm0, %v448_v3, %v450_v4 }
 0x20f   :  { %v535_v18 = vpop.permute.xlu1 %534  ;;  %v1435_v35 = vpack.c.bf16 %v1829_v46, %v532_v53  ;;  %v551_v46 = vrot.slane %v1371_v25, %v1627_v23  ;;  %v559_v53 = vrot.slane %v1371_v25, %v1637_v29 }
 0x210   :  { %v1427_v28 = vpack.c.bf16 %v1801_v33, %v530_v63  ;;  %v537_v27 = vpop.permute.xlu0 %536  ;;  %v1433_v12 = vpack.c.bf16 %v1833_v48, %v533_v1  ;;  %v458_v48 = vsel %vm66_vm0, %v454_v6, %v448_v3  ;;  %v460_v63 = vmul.f32 %v456_v49, %v1643_v31 }
 0x211   :  { %v462_v61 = vmul.f32 %v458_v48, %v1661_v43  ;;  %v488_v3 = vsel %vm174_vm2, %v1968_v15, %v1970_v16 }
 0x212   :  { %1428 = vmatpush1.bf16.msra.mxu0 %v1427_v28  ;;  %1434 = vmatprep.subr.bf16.mxu1 %v1433_v12  ;;  %v545_v12 = vsel %vm542_vm5, %v535_v18, %v537_v27  ;;  %v563_v28 = vrot.slane %v1371_v25, %v1645_v32 }
 0x213   :  { %1436 = vmatpush1.bf16.msra.mxu1 %v1435_v35  ;;  %v539_v37 = vpop.permute.xlu1 %538  ;;  %v455_v35 = vsel %vm66_vm0, %v452_v5, %v454_v6  ;;  %v568_v4 = vmul.f32 %v551_v46, %v545_v12  ;;  %v459_v12 = vmul.f32 %v457_v60, %v1640_v30 }
 0x214   :  { %v541_v44 = vpop.permute.xlu0 %540  ;;  %v544_v1 = vsel %vm542_vm5, %v537_v27, %v539_v37 }
 0x215   :  { %v543_v0 = vsel %vm542_vm5, %v539_v37, %v541_v44  ;;  %v546_v56 = vsel %vm542_vm5, %v541_v44, %v535_v18  ;;  %v569_v25 = vmul.f32 %v555_v51, %v544_v1  ;;  %v490_v51 = vsel %vm174_vm2, %v1975_v20, %v1966_v14 }
 0x216   :  { %v570_v44 = vmul.f32 %v559_v53, %v543_v0  ;;  %v571_v48 = vmul.f32 %v563_v28, %v546_v56  ;;  %v472_v56 = vsel %vm120_vm1, %v1960_v8, %v1962_v9  ;;  %v474_v1 = vsel %vm120_vm1, %v1964_v10, %v1958_v7 }
 0x217   :  { %v573_v33 = vpop.permute.xlu1 %572  ;;  %v489_v28 = vsel %vm174_vm2, %v1966_v14, %v1968_v15  ;;  %v1449_v14 = vpack.c.bf16 %v462_v61, %v1803_v34  ;;  %v1372_v34 = vld [vmem:[%s2242_s0 + $0x6] ss:$8 sm:$0xf]  ;;  %v1443_v61 = vpack.c.bf16 %v459_v12, %v1783_v17 }
 0x218   :  { %v575_v50 = vpop.permute.xlu0 %574 }
 0x219   :  { %v582_v57 = vsel %vm120_vm1, %v573_v33, %v575_v50 }
 0x21a   :  { %v584_v27 = vmul.f32 %v582_v57, %v1680_v62 }
 0x21b   :  { %v577_v42 = vpop.permute.xlu1 %576 }
 0x21c   :  { %v581_v5 = vsel %vm120_vm1, %v575_v50, %v577_v42  ;;  %v579_v6 = vpop.permute.xlu0 %578  ;;  %v461_v50 = vmul.f32 %v455_v35, %v1655_v39  ;;  %v1431_v0 = vpack.c.bf16 %v584_v27, %v568_v4  ;;  %v492_v35 = vmul.f32 %v488_v3, %v1727_v45  ;;  %v1369_v27 = vld [vmem:[%s2242_s0 + $0x3] ss:$8 sm:$0xf] }
 0x21d   :  { %v585_v49 = vmul.f32 %v581_v5, %v1687_v2  ;;  %v580_v37 = vsel %vm120_vm1, %v577_v42, %v579_v6  ;;  %v583_v18 = vsel %vm120_vm1, %v579_v6, %v573_v33  ;;  %v1441_v5 = vpack.c.bf16 %v460_v63, %v1785_v19  ;;  %v1382_v45 = vld [vmem:[%s2246_s4 + $0x8] sm:$0xff] }
 0x21e   :  { %v586_v38 = vmul.f32 %v580_v37, %v1698_v11  ;;  %v587_v46 = vmul.f32 %v583_v18, %v1701_v13  ;;  %v494_v4 = vmul.f32 %v490_v51, %v1741_v55  ;;  %v473_v19 = vsel %vm120_vm1, %v1958_v7, %v1960_v8 }
 0x21f   :  { %v2054_v57 = vpop.permute.xlu1 %881  ;;  %v1429_v42 = vpack.c.bf16 %v585_v49, %v569_v25  ;;  %v476_v55 = vmul.f32 %v472_v56, %v1687_v2  ;;  %v478_v7 = vmul.f32 %v474_v1, %v1701_v13  ;;  %v491_v2 = vmul.f32 %v489_v28, %v1720_v40 }
 0x220   :  { %v1439_v33 = vpack.c.bf16 %v586_v38, %v570_v44  ;;  %v2060_v53 = vpop.permute.xlu0 %883  ;;  %v1437_v60 = vpack.c.bf16 %v587_v46, %v571_v48  ;;  %v487_v38 = vsel %vm174_vm2, %v1970_v16, %v1975_v20  ;;  %v471_v16 = vsel %vm120_vm1, %v1962_v9, %v1964_v10 }
 0x221   :  { %1430 = vmatprep.subr.bf16.mxu0 %v1429_v42  ;;  %v1451_v20 = vpack.c.bf16 %v461_v50, %v1799_v26  ;;  %v493_v63 = vmul.f32 %v487_v38, %v1738_v54  ;;  %v2103_v3 = vrot.slane %v1369_v27, %v1629_v24  ;;  %v1445_v17 = vpack.c.bf16 %v492_v35, %v476_v55  ;;  %v495_v42 = vld [vmem:[%s2246_s4] sm:$0xff] }
 0x222   :  { %1432 = vmatpush1.bf16.msra.mxu0 %v1431_v0  ;;  %1438 = vmatprep.subr.bf16.mxu1 %v1437_v60  ;;  %v475_v6 = vmul.f32 %v473_v19, %v1680_v62  ;;  %v940_v13 = vrot.slane %v1372_v34, %v1629_v24  ;;  %v1453_v40 = vpack.c.bf16 %v494_v4, %v478_v7  ;;  %v2260_v37 = vmov 0.0  }
 0x223   :  { %1440 = vmatpush1.bf16.msra.mxu1 %v1439_v33  ;;  %1442 = vmatprep.subr.bf16.mxu0 %v1441_v5  ;;  %v886_v15 = vpop.permute.xlu1 %885  ;;  %v477_v26 = vmul.f32 %v471_v16, %v1698_v11  ;;  %v892_v54 = vsel %vm889_vm7, %v2054_v57, %v2060_v53  ;;  %v2116_v62 = vrot.slane %v1369_v27, %v1627_v23 }
 0x224   :  { %v888_v8 = vpop.permute.xlu0 %887  ;;  %1450 = vmatprep.subr.bf16.mxu1 %v1449_v14  ;;  %v1447_v10 = vpack.c.bf16 %v491_v2, %v475_v6  ;;  %v2119_v25 = vrot.slane %v1369_v27, %v1645_v32  ;;  %v944_v44 = vrot.slane %v1372_v34, %v1637_v29  ;;  %v936_v48 = vrot.slane %v1372_v34, %v1627_v23 }
 0x225   :  { %1383 = vmatmul.mubr.msk.f32.vlgmr.msra.gmra.mrb[8].mxu0 %vm590_vm6, %v1382_v45  ;;  %v1455_v11 = vpack.c.bf16 %v493_v63, %v477_v26  ;;  %v916_v46 = vmul.f32 %v2103_v3, %v892_v54  ;;  %v893_v12 = vsel %vm889_vm7, %v888_v8, %v2054_v57  ;;  %v948_v51 = vrot.slane %v1372_v34, %v1645_v32 }
 0x226   :  { %1444 = vmatpush1.bf16.msra.mxu0 %v1443_v61  ;;  %1384 = vmatmul.mubr.msk.f32.vlgmr.msra.gmra.mrb[8].mxu1 %vm590_vm6, %v1382_v45  ;;  %v2136_v56 = vrot.slane %v1369_v27, %v1637_v29  ;;  %v890_v0 = vsel %vm889_vm7, %v886_v15, %v888_v8  ;;  %v891_v57 = vsel %vm889_vm7, %v2060_v53, %v886_v15 }
 0x227   :  { %1446 = vmatprep.subr.bf16.mxu0 %v1445_v17  ;;  %1452 = vmatpush1.bf16.msra.mxu1 %v1451_v20  ;;  %v920_v9 = vpop.permute.xlu1 %919  ;;  %v915_v35 = vmul.f32 %v2116_v62, %v893_v12  ;;  %v918_v27 = vmul.f32 %v2119_v25, %v890_v0 }
 0x228   :  { %v922_v49 = vpop.permute.xlu0 %921  ;;  %1454 = vmatprep.subr.bf16.mxu1 %v1453_v40  ;;  %803 = vmatprep.mubr.f32.mxu0 %v2260_v37  ;;  %v917_v45 = vmul.f32 %v2136_v56, %v891_v57 }
 0x229   :  { %v930_v18 = vsel %vm927_vm8, %v920_v9, %v922_v49  ;;  %874 = vmatprep.mubr.f32.mxu1 %v2260_v37 }
 0x22a   :  { %v954_v50 = vmul.f32 %v940_v13, %v930_v18  ;;  %1448 = vmatpush1.bf16.msra.mxu0 %v1447_v10 }
 0x22b   :  { %1456 = vmatpush1.bf16.msra.mxu1 %v1455_v11  ;;  %v924_v33 = vpop.permute.xlu1 %923 }
 0x22c   :  { %v929_v60 = vsel %vm927_vm8, %v922_v49, %v924_v33  ;;  %v926_v1 = vpop.permute.xlu0 %925  ;;  %v1457_v28 = vpack.c.bf16 %v954_v50, %v916_v46  ;;  %v1387_v49 = vld [vmem:[%s2246_s4 + $0x10] sm:$0xff] }
 0x22d   :  { %v955_v5 = vmul.f32 %v944_v44, %v929_v60  ;;  %v928_v38 = vsel %vm927_vm8, %v924_v33, %v926_v1  ;;  %v931_v4 = vsel %vm927_vm8, %v926_v1, %v920_v9  ;;  %1385 = vmatmul.mubr.msk.f32.vlgmr.msra.gmra.mrb[8].mxu0 %vm590_vm6, %v495_v42 }
 0x22e   :  { %v953_v14 = vmul.f32 %v936_v48, %v931_v4  ;;  %v956_v53 = vmul.f32 %v948_v51, %v928_v38  ;;  %1458 = vmatprep.subr.bf16.mxu0 %v1457_v28  ;;  %1386 = vmatmul.mubr.msk.f32.vlgmr.msra.gmra.mrb[8].mxu1 %vm590_vm6, %v495_v42 }
 0x22f   :  { %v958_v19 = vpop.permute.xlu1 %957  ;;  %1042 = vmatprep.mubr.f32.mxu0 %v2260_v37  ;;  %1113 = vmatprep.mubr.f32.mxu1 %v2260_v37  ;;  %v1467_v61 = vpack.c.bf16 %v955_v5, %v917_v45 }
 0x230   :  { %v1459_v55 = vpack.c.bf16 %v953_v14, %v915_v35  ;;  %v960_v15 = vpop.permute.xlu0 %959  ;;  %v1465_v34 = vpack.c.bf16 %v956_v53, %v918_v27 }
 0x231   :  { %v967_v16 = vsel %vm66_vm0, %v958_v19, %v960_v15 }
 0x232   :  { %1460 = vmatpush1.bf16.msra.mxu0 %v1459_v55  ;;  %1466 = vmatprep.subr.bf16.mxu1 %v1465_v34  ;;  %v969_v2 = vmul.f32 %v967_v16, %v1640_v30  ;;  %v2262_v16 = vld [vmem:[#allocation6_spill] sm:$0xff] }
 0x233   :  { %1468 = vmatpush1.bf16.msra.mxu1 %v1467_v61  ;;  %v962_v7 = vpop.permute.xlu1 %961  ;;  %v2261_v61 = vld [vmem:[#allocation5_spill] sm:$0xff] }
 0x234   :  { %v966_v8 = vsel %vm66_vm0, %v960_v15, %v962_v7  ;;  %v964_v20 = vpop.permute.xlu0 %963  ;;  %v1463_v30 = vpack.c.bf16 %v969_v2, %v1827_v41  ;;  %v2263_v2 = vld [vmem:[#allocation2_spill] sm:$0xff] }
 0x235   :  { %v970_v63 = vmul.f32 %v966_v8, %v1643_v31  ;;  %v965_v17 = vsel %vm66_vm0, %v962_v7, %v964_v20  ;;  %v968_v6 = vsel %vm66_vm0, %v964_v20, %v958_v19  ;;  %v2264_v20 = vld [vmem:[#allocation4_spill] sm:$0xff] }
 0x236   :  { %v971_v13 = vmul.f32 %v965_v17, %v1655_v39  ;;  %v972_v40 = vmul.f32 %v968_v6, %v1661_v43  ;;  %v1373_v39 = vld [vmem:[%s2242_s0 + $0x7] ss:$8 sm:$0xf] }
 0x237   :  { %v1125_v26 = vpop.permute.xlu1 %1124  ;;  %v1461_v54 = vpack.c.bf16 %v970_v63, %v1831_v47  ;;  %v1145_v47 = vrot.slane %v1373_v39, %v1629_v24  ;;  %v1141_v48 = vrot.slane %v1373_v39, %v1627_v23  ;;  %v1153_v46 = vrot.slane %v1373_v39, %v1645_v32  ;;  %v2265_v17 = vld [vmem:[#allocation3_spill] sm:$0xff] }
 0x238   :  { %v1471_v9 = vpack.c.bf16 %v971_v13, %v1855_v52  ;;  %v1127_v10 = vpop.permute.xlu0 %1126  ;;  %v1469_v31 = vpack.c.bf16 %v972_v40, %v1859_v58  ;;  %v1149_v12 = vrot.slane %v1373_v39, %v1637_v29 }
 0x239   :  { %1462 = vmatprep.subr.bf16.mxu0 %v1461_v54  ;;  %v1135_v52 = vsel %vm1132_vm9, %v1125_v26, %v1127_v10 }
 0x23a   :  { %1464 = vmatpush1.bf16.msra.mxu0 %v1463_v30  ;;  %1470 = vmatprep.subr.bf16.mxu1 %v1469_v31  ;;  %v1159_v44 = vmul.f32 %v1145_v47, %v1135_v52 }
 0x23b   :  { %1472 = vmatpush1.bf16.msra.mxu1 %v1471_v9  ;;  %v1129_v43 = vpop.permute.xlu1 %1128 }
 0x23c   :  { %v1131_v41 = vpop.permute.xlu0 %1130  ;;  %v1134_v42 = vsel %vm1132_vm9, %v1127_v10, %v1129_v43 }
 0x23d   :  { %1388 = vmatmul.mubr.msk.f32.vlgmr.msra.gmra.mrb[8].mxu0 %vm590_vm6, %v1387_v49  ;;  %v1133_v50 = vsel %vm1132_vm9, %v1129_v43, %v1131_v41  ;;  %v1136_v51 = vsel %vm1132_vm9, %v1131_v41, %v1125_v26  ;;  %v1160_v35 = vmul.f32 %v1149_v12, %v1134_v42 }
 0x23e   :  { %1389 = vmatmul.mubr.msk.f32.vlgmr.msra.gmra.mrb[8].mxu1 %vm590_vm6, %v1387_v49  ;;  %1263 = vmatprep.mubr.f32.mxu0 %v2260_v37  ;;  %v1158_v57 = vmul.f32 %v1141_v48, %v1136_v51  ;;  %v1161_v60 = vmul.f32 %v1153_v46, %v1133_v50 }
 0x23f   :  { %v1163_v58 = vpop.permute.xlu1 %1162  ;;  %1334 = vmatprep.mubr.f32.mxu1 %v2260_v37 }
 0x240   :  { %v1165_v11 = vpop.permute.xlu0 %1164 }
 0x241   :  { %v1172_v18 = vsel %vm889_vm7, %v1163_v58, %v1165_v11 }
 0x242   :  { %v1175_v24 = vmul.f32 %v1172_v18, %v2103_v3 }
 0x243   :  { %v1167_v37 = vpop.permute.xlu1 %1166 }
 0x244   :  { %v1171_v0 = vsel %vm889_vm7, %v1165_v11, %v1167_v37  ;;  %v1169_v23 = vpop.permute.xlu0 %1168  ;;  %v1473_v33 = vpack.c.bf16 %v1175_v24, %v1159_v44 }
 0x245   :  { %v1176_v32 = vmul.f32 %v1171_v0, %v2136_v56  ;;  %v1170_v29 = vsel %vm889_vm7, %v1167_v37, %v1169_v23  ;;  %v1173_v3 = vsel %vm889_vm7, %v1169_v23, %v1163_v58 }
 0x246   :  { %v1174_v1 = vmul.f32 %v1173_v3, %v2116_v62  ;;  %v1177_v28 = vmul.f32 %v1170_v29, %v2119_v25  ;;  %1474 = vmatprep.subr.bf16.mxu0 %v1473_v33 }
 0x247   :  { %v1179_v5 = vpop.permute.xlu1 %1178  ;;  %v1483_v14 = vpack.c.bf16 %v1176_v32, %v1160_v35 }
 0x248   :  { %v1475_v38 = vpack.c.bf16 %v1174_v1, %v1158_v57  ;;  %v1181_v4 = vpop.permute.xlu0 %1180  ;;  %v1481_v27 = vpack.c.bf16 %v1177_v28, %v1161_v60 }
 0x249   :  { %v1188_v56 = vsel %vm504_vm4, %v1179_v5, %v1181_v4 }
 0x24a   :  { %v1191_v53 = vmul.f32 %v1188_v56, %v1979_v22  ;;  %1476 = vmatpush1.bf16.msra.mxu0 %v1475_v38  ;;  %1482 = vmatprep.subr.bf16.mxu1 %v1481_v27 }
 0x24b   :  { %1484 = vmatpush1.bf16.msra.mxu1 %v1483_v14  ;;  %v1183_v45 = vpop.permute.xlu1 %1182 }
 0x24c   :  { %v1187_v62 = vsel %vm504_vm4, %v1181_v4, %v1183_v45  ;;  %v1185_v25 = vpop.permute.xlu0 %1184  ;;  %v1477_v19 = vpack.c.bf16 %v1861_v59, %v1191_v53  ;;  %v1390_v59 = vld [vmem:[%s2246_s4 + $0x18] sm:$0xff] }
 0x24d   :  { %v1192_v55 = vmul.f32 %v1187_v62, %v1984_v36  ;;  %v1186_v15 = vsel %vm504_vm4, %v1183_v45, %v1185_v25  ;;  %v1189_v34 = vsel %vm504_vm4, %v1185_v25, %v1179_v5 }
 0x24e   :  { %v1190_v22 = vmul.f32 %v1189_v34, %v2261_v61  ;;  %v1193_v7 = vmul.f32 %v1186_v15, %v2262_v16  ;;  %1478 = vmatprep.subr.bf16.mxu0 %v1477_v19 }
 0x24f   :  { %v1487_v6 = vpack.c.bf16 %v2265_v17, %v1192_v55 }
 0x250   :  { %v1479_v8 = vpack.c.bf16 %v2263_v2, %v1190_v22  ;;  %v1485_v63 = vpack.c.bf16 %v2264_v20, %v1193_v7 }
 0x252   :  { %1480 = vmatpush1.bf16.msra.mxu0 %v1479_v8  ;;  %1486 = vmatprep.subr.bf16.mxu1 %v1485_v63 }
 0x253   :  { %1488 = vmatpush1.bf16.msra.mxu1 %v1487_v6 }
 0x255   :  { %1391 = vmatmul.mubr.msk.f32.vlgmr.msra.gmra.mrb[8].mxu0 %vm590_vm6, %v1390_v59 }
 0x256   :  { %1392 = vmatmul.mubr.msk.f32.vlgmr.msra.gmra.mrb[8].mxu1 %vm590_vm6, %v1390_v59 }
 0x25c   :  { %v1349_v21 = vpop.permute.xlu1 %1348 }
 0x328   :  { %v1265_v36 = vpop.f32.mrb[8].mxu0 }
 0x329   :  { %v1351_v13 = vadd.f32 %v1349_v21, %v1265_v36  ;;  %v1267_v40 = vpop.f32.mrb[9].mxu0  ;;  %v1336_v26 = vpop.f32.mrb[8].mxu1 }
 0x32a   :  { %v1352_v54 = vadd.f32 %v1349_v21, %v1267_v40  ;;  %v1353_v30 = vadd.f32 %v1349_v21, %v1336_v26  ;;  %v1338_v9 = vpop.f32.mrb[9].mxu1 }
 0x32b   :  { %1355 = vst [vmem:[%s2247_s7] sm:$0xff] %v1351_v13  ;;  %v1354_v10 = vadd.f32 %v1349_v21, %v1338_v9 }
 0x32c   :  { %1356 = vst [vmem:[%s2247_s7 + $0x8] sm:$0xff] %v1352_v54  ;;  %1357 = vst [vmem:[%s2247_s7 + $0x10] sm:$0xff] %v1353_v30 }
 0x32d   :  { %1358 = vst [vmem:[%s2247_s7 + $0x18] sm:$0xff] %v1354_v10 }

</bundles_post_ra>
